<compile_context>
chip_gen: v7x
topology: tpu7x:2x2x1
jax: 0.10.0
libtpu: 0.0.40
codegen_flags: <defaults>
</compile_context>

<pallas_src>
import functools

import jax
import jax.numpy as jnp
from jax.experimental import pallas as pl
from jax.experimental.pallas import tpu as pltpu


def _make_fused_kernel(H, W, Cin, Cout, NCLS):
    HW = H * W

    def kernel(x_ref, w_ref, bnb_ref, fcw_ref, fcb_ref, o_ref):
        """
        x_ref:   (1, Cin, H*W)   one batch element; channels in sublanes,
                                 flattened spatial positions in lanes
        w_ref:   (9, Cout, Cin)  conv taps (t = ky*3 + kx), BN scale folded in
        bnb_ref: (Cout, 1)       BN bias (beta - running_mean * scale)
        fcw_ref: (NCLS, Cout)    fc weight, transposed
        fcb_ref: (NCLS, 1)       fc bias
        o_ref:   (1, NCLS, 1)
        """
        x = x_ref[0].astype(jnp.float32)                         # [Cin, HW]

        # Edge-validity masks: realize padding=1 without materializing a
        # padded buffer.  Flattened position p = h*W + w over the lanes.
        col = jax.lax.broadcasted_iota(jnp.int32, (Cin, HW), 1)
        if (W & (W - 1)) == 0:                                   # W power of two
            w_idx = jnp.bitwise_and(col, W - 1)
        else:
            w_idx = jnp.remainder(col, W)
        valid = {
            (-1, 0): col >= W,             # source row h-1 exists
            (1, 0): col < (H - 1) * W,     # source row h+1 exists
            (0, -1): w_idx >= 1,           # source col w-1 exists
            (0, 1): w_idx < (W - 1),       # source col w+1 exists
        }

        # 3x3 conv as 9 accumulated MXU matmuls over lane-dense taps produced
        # by an XLU lane rotation + mask (no per-tap slice relayouts).
        acc = jnp.zeros((Cout, HW), jnp.float32)
        for ky in range(3):
            for kx in range(3):
                dy, dx = ky - 1, kx - 1
                shift = dy * W + dx        # tap[p] = x[p + shift] where valid
                tap = x if shift == 0 else pltpu.roll(x, (-shift) % HW, axis=1)
                mask = None
                for off in ((dy, 0), (0, dx)):
                    cond = valid.get(off)
                    if cond is not None:
                        mask = cond if mask is None else jnp.logical_and(mask, cond)
                if mask is not None:
                    tap = jnp.where(mask, tap, 0.0)
                acc = acc + jnp.dot(
                    w_ref[ky * 3 + kx].astype(jnp.float32), tap,
                    preferred_element_type=jnp.float32)          # [Cout, HW]

        # AdaptiveAvgPool2d(1) (+ BN bias, applied post-pool -- identical since
        # the pool is linear), Dropout (eval mode == identity), then Linear,
        # all before the single tiny output store.
        pooled = jnp.sum(acc, axis=1, keepdims=True) * (1.0 / HW) + bnb_ref[...]
        logits = jnp.dot(fcw_ref[...].astype(jnp.float32), pooled,
                         preferred_element_type=jnp.float32) + fcb_ref[...]
        o_ref[0] = logits.astype(o_ref.dtype)

    return kernel


@functools.partial(jax.jit, static_argnames=("H", "W"))
def _fused_forward(x_nchw, w_taps, bn_bias, fc_w_t, fc_b, *, H, W):
    B, Cin = x_nchw.shape[0], x_nchw.shape[1]
    HW = H * W
    Cout = w_taps.shape[1]
    NCLS = fc_w_t.shape[0]
    # NCHW is already the lane-friendly layout: collapsing H, W is a free
    # metadata reshape (no transpose, no pad on the host/XLA side).
    x_flat = x_nchw.reshape(B, Cin, HW)

    out = pl.pallas_call(
        _make_fused_kernel(H, W, Cin, Cout, NCLS),
        out_shape=jax.ShapeDtypeStruct((B, NCLS, 1), jnp.float32),
        grid=(B,),
        in_specs=[
            pl.BlockSpec((1, Cin, HW), lambda b: (b, 0, 0)),
            # Parameters: constant block index -> stay VMEM-resident across
            # the batch grid.
            pl.BlockSpec((9, Cout, Cin), lambda b: (0, 0, 0)),
            pl.BlockSpec((Cout, 1), lambda b: (0, 0)),
            pl.BlockSpec((NCLS, Cout), lambda b: (0, 0)),
            pl.BlockSpec((NCLS, 1), lambda b: (0, 0)),
        ],
        out_specs=pl.BlockSpec((1, NCLS, 1), lambda b: (b, 0, 0)),
        compiler_params=pltpu.CompilerParams(
            dimension_semantics=("parallel",)),   # v7x: one batch element / TC
    )(x_flat, w_taps, bn_bias, fc_w_t, fc_b)
    return out.reshape(B, NCLS)


class NASNetworkTIPallas:
    def __init__(self, input_size, channels, num_classes, num_blocks,
                 num_nodes, num_conv_cells, dropout, key):
        assert num_blocks == 0, (
            "Cell_TI source not available; only the num_blocks=0 configuration "
            "is translated exactly."
        )
        del num_nodes, num_conv_cells  # only used by Cell_TI
        self.dropout_p = dropout       # eval-mode dropout == identity
        cin = input_size[0]
        cout = channels
        eps = 1e-5

        k = jax.random.split(key, 6)
        # stem conv (bias=False); PyTorch weight [Cout, Cin, 3, 3] kept as HWIO.
        self.stem_w = 0.1 * jax.random.normal(k[0], (3, 3, cin, cout), jnp.float32)
        # BatchNorm2d params + running stats, folded for eval mode.
        gamma = 1.0 + 0.05 * jax.random.normal(k[1], (cout,), jnp.float32)
        beta = 0.05 * jax.random.normal(k[2], (cout,), jnp.float32)
        running_mean = 0.05 * jax.random.normal(k[3], (cout,), jnp.float32)
        running_var = jnp.abs(1.0 + 0.05 * jax.random.normal(k[4], (cout,), jnp.float32))
        self.bn_scale = gamma / jnp.sqrt(running_var + eps)   # (cout,)
        self.bn_bias = beta - running_mean * self.bn_scale    # (cout,)

        # fc: Linear(output_sizes[-1][0] == channels, num_classes)
        kw, kb = jax.random.split(k[5])
        bound = 1.0 / (cout ** 0.5)
        self.fc_w = jax.random.uniform(kw, (cout, num_classes), jnp.float32,
                                       minval=-bound, maxval=bound)
        self.fc_b = jax.random.uniform(kb, (num_classes,), jnp.float32,
                                       minval=-bound, maxval=bound)

        # Kernel-layout parameters.
        #  - conv taps as (tap, Cout, Cin) with tap t = ky*3 + kx,
        #    BN scale folded in: scale[co] * (sum w*x) == sum (scale[co]*w)*x.
        w_taps = jnp.transpose(self.stem_w, (0, 1, 3, 2)).reshape(9, cout, cin)
        self.w_taps_scaled = w_taps * self.bn_scale[None, :, None]
        self.bn_bias_col = self.bn_bias.reshape(cout, 1)
        self.fc_w_t = jnp.transpose(self.fc_w)                 # (ncls, cout)
        self.fc_b_col = self.fc_b.reshape(num_classes, 1)

    def __call__(self, x_nchw):
        _, _, H, W = x_nchw.shape
        # forward: stem -> (empty cell list for num_blocks=0) -> pool -> fc
        return _fused_forward(x_nchw, self.w_taps_scaled, self.bn_bias_col,
                              self.fc_w_t, self.fc_b_col, H=H, W=W)

    def reference(self, x_nchw):
        """Pure-JAX reference of the same forward pass (correctness gate)."""
        conv = jax.lax.conv_general_dilated(
            x_nchw, self.stem_w, window_strides=(1, 1),
            padding=((1, 1), (1, 1)),
            dimension_numbers=("NCHW", "HWIO", "NCHW"),
            precision=jax.lax.Precision.HIGHEST)
        y = (conv * self.bn_scale[None, :, None, None]
             + self.bn_bias[None, :, None, None])
        pooled = jnp.mean(y, axis=(2, 3))
        return jnp.dot(pooled, self.fc_w,
                       precision=jax.lax.Precision.HIGHEST) + self.fc_b[None, :]


if __name__ == "__main__":
    key = jax.random.PRNGKey(0)
    k_param, k_x = jax.random.split(key)

    # Small shapes consistent with the module: image [3, 16, 16], batch 2.
    input_size = [3, 16, 16]
    channels = 8
    num_classes = 10

    model = NASNetworkTIPallas(
        input_size=list(input_size), channels=channels, num_classes=num_classes,
        num_blocks=0, num_nodes=4, num_conv_cells=3, dropout=0.0, key=k_param,
    )

    x = jax.random.normal(k_x, (2, 3, 16, 16), jnp.float32)  # NCHW, like PyTorch
    out = jax.block_until_ready(model(x))
    assert out.shape == (2, num_classes), out.shape

    # Correctness gate against the pure-JAX reference.
    ref = jax.block_until_ready(model.reference(x))
    if not bool(jnp.allclose(out, ref, atol=2e-3, rtol=2e-3)):
        max_err = float(jnp.max(jnp.abs(out - ref)))
        raise AssertionError(f"Pallas output mismatch vs reference, max|err|={max_err}")

    print("KERNEL_OK")
</pallas_src>

<mosaic_0001>
module attributes {stable_mosaic.version = 11 : i64} {
  func.func @kernel(%arg0: i32, %arg1: memref<1x3x256xf32, #tpu.memory_space<vmem>>, %arg2: memref<9x8x3xf32, #tpu.memory_space<vmem>>, %arg3: memref<8x1xf32, #tpu.memory_space<vmem>>, %arg4: memref<10x8xf32, #tpu.memory_space<vmem>>, %arg5: memref<10x1xf32, #tpu.memory_space<vmem>>, %arg6: memref<1x10x1xf32, #tpu.memory_space<vmem>>) attributes {dimension_semantics = [#tpu.dimension_semantics<parallel>], iteration_bounds = array<i64: 2>, scalar_prefetch = 0 : i64, scratch_operands = 0 : i64, tpu.core_type = #tpu.core_type<tc>, window_params = [{transform_indices = @transform_0, window_bounds = array<i64: 1, 3, 256>}, {pipeline_mode = #tpu.pipeline_mode<synchronous>, transform_indices = @transform_1, window_bounds = array<i64: 9, 8, 3>}, {pipeline_mode = #tpu.pipeline_mode<synchronous>, transform_indices = @transform_2, window_bounds = array<i64: 8, 1>}, {pipeline_mode = #tpu.pipeline_mode<synchronous>, transform_indices = @transform_3, window_bounds = array<i64: 10, 8>}, {pipeline_mode = #tpu.pipeline_mode<synchronous>, transform_indices = @transform_4, window_bounds = array<i64: 10, 1>}, {transform_indices = @transform_5, window_bounds = array<i64: 1, 10, 1>}]} {
    %c0 = arith.constant 0 : index
    %c0_0 = arith.constant 0 : index
    %c0_1 = arith.constant 0 : index
    %0 = vector.load %arg1[%c0, %c0_0, %c0_1] : memref<1x3x256xf32, #tpu.memory_space<vmem>>, vector<1x3x256xf32>
    %1 = vector.shape_cast %0 : vector<1x3x256xf32> to vector<3x256xf32>
    %2 = tpu.iota {dimensions = array<i32: 1>} : vector<3x256xi32>
    %c15_i32 = arith.constant 15 : i32
    %3 = vector.broadcast %c15_i32 : i32 to vector<3x256xi32>
    %4 = arith.andi %2, %3 : vector<3x256xi32>
    %c16_i32 = arith.constant 16 : i32
    %5 = vector.broadcast %c16_i32 : i32 to vector<3x256xi32>
    %6 = arith.cmpi sge, %2, %5 : vector<3x256xi32>
    %c240_i32 = arith.constant 240 : i32
    %7 = vector.broadcast %c240_i32 : i32 to vector<3x256xi32>
    %8 = arith.cmpi slt, %2, %7 : vector<3x256xi32>
    %c1_i32 = arith.constant 1 : i32
    %9 = vector.broadcast %c1_i32 : i32 to vector<3x256xi32>
    %10 = arith.cmpi sge, %4, %9 : vector<3x256xi32>
    %c15_i32_2 = arith.constant 15 : i32
    %11 = vector.broadcast %c15_i32_2 : i32 to vector<3x256xi32>
    %12 = arith.cmpi slt, %4, %11 : vector<3x256xi32>
    %cst = arith.constant 0.000000e+00 : f32
    %13 = vector.broadcast %cst : f32 to vector<8x256xf32>
    %c17_i32 = arith.constant 17 : i32
    %14 = tpu.dynamic_rotate %1 by %c17_i32 dim 1 : vector<3x256xf32>, i32 -> vector<3x256xf32>
    %15 = arith.andi %6, %10 : vector<3x256xi1>
    %cst_3 = arith.constant 0.000000e+00 : f32
    %16 = vector.broadcast %cst_3 : f32 to vector<3x256xf32>
    %17 = arith.select %15, %14, %16 : vector<3x256xi1>, vector<3x256xf32>
    %c0_4 = arith.constant 0 : index
    %c0_5 = arith.constant 0 : index
    %c0_6 = arith.constant 0 : index
    %18 = vector.load %arg2[%c0_4, %c0_5, %c0_6] : memref<9x8x3xf32, #tpu.memory_space<vmem>>, vector<1x8x3xf32>
    %19 = vector.shape_cast %18 : vector<1x8x3xf32> to vector<8x3xf32>
    %cst_7 = arith.constant dense<0.000000e+00> : vector<8x256xf32>
    %20 = tpu.matmul %19, %17, %cst_7 {dimension_numbers = #tpu.dot_dimension_numbers<[1], [0], [0], [1], [0, 0, 1, 1], [], []>} : vector<8x3xf32>, vector<3x256xf32>, vector<8x256xf32> -> vector<8x256xf32>
    %21 = arith.addf %13, %20 : vector<8x256xf32>
    %c16_i32_8 = arith.constant 16 : i32
    %22 = tpu.dynamic_rotate %1 by %c16_i32_8 dim 1 : vector<3x256xf32>, i32 -> vector<3x256xf32>
    %cst_9 = arith.constant 0.000000e+00 : f32
    %23 = vector.broadcast %cst_9 : f32 to vector<3x256xf32>
    %24 = arith.select %6, %22, %23 : vector<3x256xi1>, vector<3x256xf32>
    %c1 = arith.constant 1 : index
    %c0_10 = arith.constant 0 : index
    %c0_11 = arith.constant 0 : index
    %25 = vector.load %arg2[%c1, %c0_10, %c0_11] : memref<9x8x3xf32, #tpu.memory_space<vmem>>, vector<1x8x3xf32>
    %26 = vector.shape_cast %25 : vector<1x8x3xf32> to vector<8x3xf32>
    %cst_12 = arith.constant dense<0.000000e+00> : vector<8x256xf32>
    %27 = tpu.matmul %26, %24, %cst_12 {dimension_numbers = #tpu.dot_dimension_numbers<[1], [0], [0], [1], [0, 0, 1, 1], [], []>} : vector<8x3xf32>, vector<3x256xf32>, vector<8x256xf32> -> vector<8x256xf32>
    %28 = arith.addf %21, %27 : vector<8x256xf32>
    %c15_i32_13 = arith.constant 15 : i32
    %29 = tpu.dynamic_rotate %1 by %c15_i32_13 dim 1 : vector<3x256xf32>, i32 -> vector<3x256xf32>
    %30 = arith.andi %6, %12 : vector<3x256xi1>
    %cst_14 = arith.constant 0.000000e+00 : f32
    %31 = vector.broadcast %cst_14 : f32 to vector<3x256xf32>
    %32 = arith.select %30, %29, %31 : vector<3x256xi1>, vector<3x256xf32>
    %c2 = arith.constant 2 : index
    %c0_15 = arith.constant 0 : index
    %c0_16 = arith.constant 0 : index
    %33 = vector.load %arg2[%c2, %c0_15, %c0_16] : memref<9x8x3xf32, #tpu.memory_space<vmem>>, vector<1x8x3xf32>
    %34 = vector.shape_cast %33 : vector<1x8x3xf32> to vector<8x3xf32>
    %cst_17 = arith.constant dense<0.000000e+00> : vector<8x256xf32>
    %35 = tpu.matmul %34, %32, %cst_17 {dimension_numbers = #tpu.dot_dimension_numbers<[1], [0], [0], [1], [0, 0, 1, 1], [], []>} : vector<8x3xf32>, vector<3x256xf32>, vector<8x256xf32> -> vector<8x256xf32>
    %36 = arith.addf %28, %35 : vector<8x256xf32>
    %c1_i32_18 = arith.constant 1 : i32
    %37 = tpu.dynamic_rotate %1 by %c1_i32_18 dim 1 : vector<3x256xf32>, i32 -> vector<3x256xf32>
    %cst_19 = arith.constant 0.000000e+00 : f32
    %38 = vector.broadcast %cst_19 : f32 to vector<3x256xf32>
    %39 = arith.select %10, %37, %38 : vector<3x256xi1>, vector<3x256xf32>
    %c3 = arith.constant 3 : index
    %c0_20 = arith.constant 0 : index
    %c0_21 = arith.constant 0 : index
    %40 = vector.load %arg2[%c3, %c0_20, %c0_21] : memref<9x8x3xf32, #tpu.memory_space<vmem>>, vector<1x8x3xf32>
    %41 = vector.shape_cast %40 : vector<1x8x3xf32> to vector<8x3xf32>
    %cst_22 = arith.constant dense<0.000000e+00> : vector<8x256xf32>
    %42 = tpu.matmul %41, %39, %cst_22 {dimension_numbers = #tpu.dot_dimension_numbers<[1], [0], [0], [1], [0, 0, 1, 1], [], []>} : vector<8x3xf32>, vector<3x256xf32>, vector<8x256xf32> -> vector<8x256xf32>
    %43 = arith.addf %36, %42 : vector<8x256xf32>
    %c4 = arith.constant 4 : index
    %c0_23 = arith.constant 0 : index
    %c0_24 = arith.constant 0 : index
    %44 = vector.load %arg2[%c4, %c0_23, %c0_24] : memref<9x8x3xf32, #tpu.memory_space<vmem>>, vector<1x8x3xf32>
    %45 = vector.shape_cast %44 : vector<1x8x3xf32> to vector<8x3xf32>
    %cst_25 = arith.constant dense<0.000000e+00> : vector<8x256xf32>
    %46 = tpu.matmul %45, %1, %cst_25 {dimension_numbers = #tpu.dot_dimension_numbers<[1], [0], [0], [1], [0, 0, 1, 1], [], []>} : vector<8x3xf32>, vector<3x256xf32>, vector<8x256xf32> -> vector<8x256xf32>
    %47 = arith.addf %43, %46 : vector<8x256xf32>
    %c255_i32 = arith.constant 255 : i32
    %48 = tpu.dynamic_rotate %1 by %c255_i32 dim 1 : vector<3x256xf32>, i32 -> vector<3x256xf32>
    %cst_26 = arith.constant 0.000000e+00 : f32
    %49 = vector.broadcast %cst_26 : f32 to vector<3x256xf32>
    %50 = arith.select %12, %48, %49 : vector<3x256xi1>, vector<3x256xf32>
    %c5 = arith.constant 5 : index
    %c0_27 = arith.constant 0 : index
    %c0_28 = arith.constant 0 : index
    %51 = vector.load %arg2[%c5, %c0_27, %c0_28] : memref<9x8x3xf32, #tpu.memory_space<vmem>>, vector<1x8x3xf32>
    %52 = vector.shape_cast %51 : vector<1x8x3xf32> to vector<8x3xf32>
    %cst_29 = arith.constant dense<0.000000e+00> : vector<8x256xf32>
    %53 = tpu.matmul %52, %50, %cst_29 {dimension_numbers = #tpu.dot_dimension_numbers<[1], [0], [0], [1], [0, 0, 1, 1], [], []>} : vector<8x3xf32>, vector<3x256xf32>, vector<8x256xf32> -> vector<8x256xf32>
    %54 = arith.addf %47, %53 : vector<8x256xf32>
    %c241_i32 = arith.constant 241 : i32
    %55 = tpu.dynamic_rotate %1 by %c241_i32 dim 1 : vector<3x256xf32>, i32 -> vector<3x256xf32>
    %56 = arith.andi %8, %10 : vector<3x256xi1>
    %cst_30 = arith.constant 0.000000e+00 : f32
    %57 = vector.broadcast %cst_30 : f32 to vector<3x256xf32>
    %58 = arith.select %56, %55, %57 : vector<3x256xi1>, vector<3x256xf32>
    %c6 = arith.constant 6 : index
    %c0_31 = arith.constant 0 : index
    %c0_32 = arith.constant 0 : index
    %59 = vector.load %arg2[%c6, %c0_31, %c0_32] : memref<9x8x3xf32, #tpu.memory_space<vmem>>, vector<1x8x3xf32>
    %60 = vector.shape_cast %59 : vector<1x8x3xf32> to vector<8x3xf32>
    %cst_33 = arith.constant dense<0.000000e+00> : vector<8x256xf32>
    %61 = tpu.matmul %60, %58, %cst_33 {dimension_numbers = #tpu.dot_dimension_numbers<[1], [0], [0], [1], [0, 0, 1, 1], [], []>} : vector<8x3xf32>, vector<3x256xf32>, vector<8x256xf32> -> vector<8x256xf32>
    %62 = arith.addf %54, %61 : vector<8x256xf32>
    %c240_i32_34 = arith.constant 240 : i32
    %63 = tpu.dynamic_rotate %1 by %c240_i32_34 dim 1 : vector<3x256xf32>, i32 -> vector<3x256xf32>
    %cst_35 = arith.constant 0.000000e+00 : f32
    %64 = vector.broadcast %cst_35 : f32 to vector<3x256xf32>
    %65 = arith.select %8, %63, %64 : vector<3x256xi1>, vector<3x256xf32>
    %c7 = arith.constant 7 : index
    %c0_36 = arith.constant 0 : index
    %c0_37 = arith.constant 0 : index
    %66 = vector.load %arg2[%c7, %c0_36, %c0_37] : memref<9x8x3xf32, #tpu.memory_space<vmem>>, vector<1x8x3xf32>
    %67 = vector.shape_cast %66 : vector<1x8x3xf32> to vector<8x3xf32>
    %cst_38 = arith.constant dense<0.000000e+00> : vector<8x256xf32>
    %68 = tpu.matmul %67, %65, %cst_38 {dimension_numbers = #tpu.dot_dimension_numbers<[1], [0], [0], [1], [0, 0, 1, 1], [], []>} : vector<8x3xf32>, vector<3x256xf32>, vector<8x256xf32> -> vector<8x256xf32>
    %69 = arith.addf %62, %68 : vector<8x256xf32>
    %c239_i32 = arith.constant 239 : i32
    %70 = tpu.dynamic_rotate %1 by %c239_i32 dim 1 : vector<3x256xf32>, i32 -> vector<3x256xf32>
    %71 = arith.andi %8, %12 : vector<3x256xi1>
    %cst_39 = arith.constant 0.000000e+00 : f32
    %72 = vector.broadcast %cst_39 : f32 to vector<3x256xf32>
    %73 = arith.select %71, %70, %72 : vector<3x256xi1>, vector<3x256xf32>
    %c8 = arith.constant 8 : index
    %c0_40 = arith.constant 0 : index
    %c0_41 = arith.constant 0 : index
    %74 = vector.load %arg2[%c8, %c0_40, %c0_41] : memref<9x8x3xf32, #tpu.memory_space<vmem>>, vector<1x8x3xf32>
    %75 = vector.shape_cast %74 : vector<1x8x3xf32> to vector<8x3xf32>
    %cst_42 = arith.constant dense<0.000000e+00> : vector<8x256xf32>
    %76 = tpu.matmul %75, %73, %cst_42 {dimension_numbers = #tpu.dot_dimension_numbers<[1], [0], [0], [1], [0, 0, 1, 1], [], []>} : vector<8x3xf32>, vector<3x256xf32>, vector<8x256xf32> -> vector<8x256xf32>
    %77 = arith.addf %69, %76 : vector<8x256xf32>
    %cst_43 = arith.constant dense<0.000000e+00> : vector<8xf32>
    %78 = vector.multi_reduction <add>, %77, %cst_43 [1] : vector<8x256xf32> to vector<8xf32>
    %79 = vector.shape_cast %78 : vector<8xf32> to vector<8x1xf32>
    %cst_44 = arith.constant 3.906250e-03 : f32
    %80 = vector.broadcast %cst_44 : f32 to vector<8x1xf32>
    %81 = arith.mulf %79, %80 : vector<8x1xf32>
    %c0_45 = arith.constant 0 : index
    %c0_46 = arith.constant 0 : index
    %82 = vector.load %arg3[%c0_45, %c0_46] : memref<8x1xf32, #tpu.memory_space<vmem>>, vector<8x1xf32>
    %83 = arith.addf %81, %82 : vector<8x1xf32>
    %c0_47 = arith.constant 0 : index
    %c0_48 = arith.constant 0 : index
    %84 = vector.load %arg4[%c0_47, %c0_48] : memref<10x8xf32, #tpu.memory_space<vmem>>, vector<10x8xf32>
    %cst_49 = arith.constant dense<0.000000e+00> : vector<10x1xf32>
    %85 = tpu.matmul %84, %83, %cst_49 {dimension_numbers = #tpu.dot_dimension_numbers<[1], [0], [0], [1], [0, 0, 1, 1], [], []>} : vector<10x8xf32>, vector<8x1xf32>, vector<10x1xf32> -> vector<10x1xf32>
    %c0_50 = arith.constant 0 : index
    %c0_51 = arith.constant 0 : index
    %86 = vector.load %arg5[%c0_50, %c0_51] : memref<10x1xf32, #tpu.memory_space<vmem>>, vector<10x1xf32>
    %87 = arith.addf %85, %86 : vector<10x1xf32>
    %c0_52 = arith.constant 0 : index
    %c0_53 = arith.constant 0 : index
    %c0_54 = arith.constant 0 : index
    %88 = vector.load %arg6[%c0_52, %c0_53, %c0_54] : memref<1x10x1xf32, #tpu.memory_space<vmem>>, vector<1x10x1xf32>
    %89 = vector.shape_cast %88 : vector<1x10x1xf32> to vector<10x1xf32>
    %90 = vector.shape_cast %87 : vector<10x1xf32> to vector<1x10x1xf32>
    tpu.vector_store %arg6[%c0_52, %c0_53, %c0_54], %90 {strides = array<i32>} : memref<1x10x1xf32, #tpu.memory_space<vmem>>, vector<1x10x1xf32>,
    return
  }
  func.func @transform_0(%arg0: i32) -> (i32, i32, i32) {
    %c0_i32 = arith.constant 0 : i32
    %c0_i32_0 = arith.constant 0 : i32
    %c0_i32_1 = arith.constant 0 : i32
    return %arg0, %c0_i32, %c0_i32_0 : i32, i32, i32
  }
  func.func @transform_1(%arg0: i32) -> (i32, i32, i32) {
    %c0_i32 = arith.constant 0 : i32
    %c0_i32_0 = arith.constant 0 : i32
    %c0_i32_1 = arith.constant 0 : i32
    %c0_i32_2 = arith.constant 0 : i32
    return %c0_i32, %c0_i32_0, %c0_i32_1 : i32, i32, i32
  }
  func.func @transform_2(%arg0: i32) -> (i32, i32) {
    %c0_i32 = arith.constant 0 : i32
    %c0_i32_0 = arith.constant 0 : i32
    %c0_i32_1 = arith.constant 0 : i32
    return %c0_i32, %c0_i32_0 : i32, i32
  }
  func.func @transform_3(%arg0: i32) -> (i32, i32) {
    %c0_i32 = arith.constant 0 : i32
    %c0_i32_0 = arith.constant 0 : i32
    %c0_i32_1 = arith.constant 0 : i32
    return %c0_i32, %c0_i32_0 : i32, i32
  }
  func.func @transform_4(%arg0: i32) -> (i32, i32) {
    %c0_i32 = arith.constant 0 : i32
    %c0_i32_0 = arith.constant 0 : i32
    %c0_i32_1 = arith.constant 0 : i32
    return %c0_i32, %c0_i32_0 : i32, i32
  }
  func.func @transform_5(%arg0: i32) -> (i32, i32, i32) {
    %c0_i32 = arith.constant 0 : i32
    %c0_i32_0 = arith.constant 0 : i32
    %c0_i32_1 = arith.constant 0 : i32
    return %arg0, %c0_i32, %c0_i32_0 : i32, i32, i32
  }
}

</mosaic_0001>

<bundles_post_ra>
// kernel: _fused_forward.1
= control target key start
LH: loop header
LB: loop body
LE: loop exit
PB: predicated region body
PF: predicated region fallthrough
CT: control target
= control target key end

     0   :  { %s1363_s18 = smov 0   ;;  %s1543_s0 = inlined_call_operand.vmem [shape: f32[2,3,256], index: 0, kind: input, shape index: {}]   ;;  %s1544_s1 = inlined_call_operand.vmem [shape: f32[9,8,3], index: 1, kind: input, shape index: {}]   ;;  %s1545_s2 = inlined_call_operand.vmem [shape: f32[8,1], index: 2, kind: input, shape index: {}]   ;;  %s1546_s3 = inlined_call_operand.vmem [shape: f32[10,8], index: 3, kind: input, shape index: {}]   ;;  %s1547_s4 = inlined_call_operand.vmem [shape: f32[10,1], index: 4, kind: input, shape index: {}]   ;;  %s1548_s5 = inlined_call_operand.vmem [shape: f32[2,10,1], index: 5, kind: output, shape index: {}]  }
   0x1 LB: > { %s1224_s19 = sadd.s32 4294967295, %s1322_s18   ;;  %p1228_p0 = scmp.ge.s32.totalorder %s1322_s18, 1  ;;  %s1322_s18 = sphi %s1363_s18, %s15_s18  }
   0x2   : > { %p187_p1 = scmp.lt.s32.totalorder %s1322_s18, 3 }
   0x4   : > { %p188_p2 = pnand %p1228_p0, %p187_p1 }
   0x5   : > { %p215_p3 = scmp.lt.s32.totalorder (!%p188_p2), %s1224_s19, 1  ;;  %v1324_v0 = vmov (!%p188_p2), 0.0   ;;  %vm269_vm0 = vcmask (!%p188_p2), 1042432   ;;  %s1325_s24 = smov (!%p188_p2), 16   ;;  %vm265_vm1 = vcmask (!%p188_p2), 23552   ;;  %v1248_v3 = vld [vmem:[%s1544_s1 + $0x20] sm:$0xff] (!%p188_p2)  ;;  %v226_v4 = vlaneseq (!%p188_p2) }
   0x6   : > { %191 = sbr.rel (%p188_p2) target bundleno = 745 (0x2e9), region = 40  ;;  %688 = vmatprep.mubr.f32.mxu0 (!%p188_p2), %v1324_v0  ;;  %340 = vmatprep.mubr.f32.mxu1 (!%p188_p2), %v1324_v0  ;;  %s1326_s25 = smov (!%p188_p2), 127   ;;  %v1233_v20 = vld [vmem:[%s1544_s1 + $0x8] sm:$0xff] (!%p188_p2)  ;;  %v253_v37 = vld [vmem:[%s1544_s1] sm:$0xff] (!%p188_p2)  ;;  %v1256_v40 = vld [vmem:[%s1544_s1 + $0x30] sm:$0xff] (!%p188_p2) }
   0x7   : > { %s1327_s28 = smov (!%p188_p2), 17   ;;  %s1328_s29 = smov (!%p188_p2), 113   ;;  %v1386_v5 = vand.u32 (!%p188_p2), 127, %v226_v4  ;;  %v1252_v24 = vld [vmem:[%s1544_s1 + $0x28] sm:$0xff] (!%p188_p2)  ;;  %v1240_v51 = vld [vmem:[%s1544_s1 + $0x10] sm:$0xff] (!%p188_p2)  ;;  %v1260_v53 = vld [vmem:[%s1544_s1 + $0x38] sm:$0xff] (!%p188_p2) }
   0x8   : > { %s1329_s30 = smov (!%p188_p2), 15   ;;  %s1330_s6 = smov (!%p188_p2), 112   ;;  %v1264_v4 = vld [vmem:[%s1544_s1 + $0x40] sm:$0xff] (!%p188_p2) }
   0x9   : > { %s1331_s7 = smov (!%p188_p2), 1   ;;  %s1332_s8 = smov (!%p188_p2), 111   ;;  %v1389_v6 = vadd.s32 (!%p188_p2), 128, %v1386_v5  ;;  %v229_v7 = vand.u32 (!%p188_p2), 15, %v1386_v5  ;;  %vm258_vm2 = vcmp.lt.s32.totalorder (!%p188_p2), %v1386_v5, 16  ;;  %vm701_vm3 = vcmp.lt.s32.totalorder (!%p188_p2), %v1386_v5, 127 }
   0xa   : > { %vm231_vm6 = vcmp.ge.s32.totalorder (!%p188_p2), %v1386_v5, 16  ;;  %vm246_vm8 = vcmp.lt.s32.totalorder (!%p188_p2), %v1386_v5, 17  ;;  %vm794_vm12 = vcmp.lt.s32.totalorder (!%p188_p2), %v1386_v5, 113  ;;  %vm431_vm14 = vcmp.lt.s32.totalorder (!%p188_p2), %v1386_v5, 15  ;;  %v1079_v12 = vld [vmem:[%s1546_s3] sm:$0xff] (!%p188_p2) }
   0xb   : > { %v230_v8 = vand.u32 (!%p188_p2), 15, %v1389_v6  ;;  %vm1395_vm4 = vcmp.lt.s32.totalorder (!%p188_p2), %v229_v7, 15  ;;  %vm1404_vm7 = vcmp.ge.s32.totalorder (!%p188_p2), %v229_v7, 1  ;;  %vm234_vm11 = vcmp.lt.s32.totalorder (!%p188_p2), %v1389_v6, 240 }
   0xc   : > { %vm1432_vm10 = vmand (!%p188_p2), %vm231_vm6, %vm1404_vm7 }
   0xd   : > { %s1562_s19 = smov (!%p215_p3, %s1224_s19), 1  ;;  %vm1399_vm5 = vcmp.lt.s32.totalorder %v230_v8, 15  ;;  %vm1424_vm9 = vcmp.ge.s32.totalorder %v230_v8, 1  ;;  %vm1467_vm15 = vmand %vm231_vm6, %vm1395_vm4 }
   0xe   : > { %s1272_s20 = sshll.u32 %s1562_s19, 3  ;;  %vm798_vm13 = vmand %vm234_vm11, %vm1424_vm9 }
   0xf   : > { %s219_s23 = scalar_lea.vmem %s1543_s0, %s1272_s20 }
  0x10   : > { %v225_v1 = vld [vmem:[%s219_s23] sm:$0x77] }
  0x11   : > { %254 = vrot.lane.b32.xlu1 %v225_v1, %s1325_s24  ;;  %697 = vrot.lane.b32.xlu0 %v225_v1, %s1326_s25  ;;  %v240_v2 = vcombine.high %v225_v1, %v225_v1 }
  0x13   : > { %1249 = vmatprep.subr.msk.mxu0 %vm269_vm0, %v240_v2 }
  0x14   : > { %1250 = vmatpush1.msk.msra.mxu0 %vm269_vm0, %v225_v1 }
  0x15   : > { %256 = vrot.lane.b32.xlu1 %v240_v2, %s1325_s24  ;;  %699 = vrot.lane.b32.xlu0 %v240_v2, %s1326_s25 }
  0x16   : > { %1251 = vmatmul.mubr.msk.f32.vlgmr.msra.gmra.mrb[0].mxu0 %vm265_vm1, %v1248_v3 }
  0x17   : > { %781 = vmatprep.mubr.f32.mxu0 %v1324_v0 }
  0x19   : > { %244 = vrot.lane.b32.xlu1 %v240_v2, %s1327_s28  ;;  %242 = vrot.lane.b32.xlu0 %v225_v1, %s1327_s28 }
  0x1d   : > { %792 = vrot.lane.b32.xlu1 %v240_v2, %s1328_s29  ;;  %790 = vrot.lane.b32.xlu0 %v225_v1, %s1328_s29 }
  0x21   : > { %429 = vrot.lane.b32.xlu1 %v240_v2, %s1329_s30  ;;  %427 = vrot.lane.b32.xlu0 %v225_v1, %s1329_s30 }
  0x25   : > { %887 = vrot.lane.b32.xlu1 %v240_v2, %s1330_s6  ;;  %885 = vrot.lane.b32.xlu0 %v225_v1, %s1330_s6 }
  0x29   : > { %524 = vrot.lane.b32.xlu1 %v240_v2, %s1331_s7  ;;  %522 = vrot.lane.b32.xlu0 %v225_v1, %s1331_s7 }
  0x2d   : > { %980 = vrot.lane.b32.xlu1 %v240_v2, %s1332_s8  ;;  %978 = vrot.lane.b32.xlu0 %v225_v1, %s1332_s8  ;;  %v1244_v2 = vld [vmem:[%s1544_s1 + $0x18] sm:$0xff]  ;;  %s1273_s8 = sshll.u32 %s1562_s19, 4 }
  0x2e   : > { %s224_s15 = scalar_lea.vmem %s1548_s5, %s1273_s8 }
  0x83   : > { %v255_v9 = vpop.permute.xlu1 %254  ;;  %v698_v10 = vpop.permute.xlu0 %697 }
  0x87   : > { %v257_v13 = vpop.permute.xlu1 %256  ;;  %v700_v14 = vpop.permute.xlu0 %699 }
  0x88   : > { %v260_v16 = vsel %vm258_vm2, %v257_v13, %v255_v9  ;;  %v702_v17 = vsel %vm701_vm3, %v698_v10, %v700_v14  ;;  %v703_v18 = vsel %vm701_vm3, %v700_v14, %v698_v10  ;;  %v259_v19 = vsel %vm258_vm2, %v255_v9, %v257_v13  ;;  %v1077_v13 = vld [vmem:[%s1545_s2] sm:$0xff] }
  0x89   : > { %v704_v21 = vsel %vm1395_vm4, %v702_v17, 0.0  ;;  %v705_v22 = vsel %vm1399_vm5, %v703_v18, 0.0  ;;  %1234 = vmatprep.subr.msk.mxu1 %vm269_vm0, %v259_v19  ;;  %v261_v23 = vsel %vm231_vm6, %v260_v16, 0.0  ;;  %vm889_vm2 = vcmp.lt.s32.totalorder %v1386_v5, 112  ;;  %v1080_v17 = vld [vmem:[%s1546_s3 + $0x8] sm:$0x3] }
  0x8a   : > { %1235 = vmatpush1.msk.msra.mxu1 %vm269_vm0, %v261_v23  ;;  %1253 = vmatprep.subr.msk.mxu0 %vm269_vm0, %v705_v22  ;;  %vm526_vm3 = vcmp.lt.s32.totalorder %v1386_v5, 1  ;;  %vm982_vm6 = vcmp.lt.s32.totalorder %v1386_v5, 111  ;;  %v1082_v18 = vld [vmem:[%s1547_s4 + $0x8] sm:$0x3]  ;;  %v1081_v19 = vld [vmem:[%s1547_s4] sm:$0xff] }
  0x8b   : > { %1236 = vmatmul.mubr.msk.f32.vlgmr.msra.gmra.mrb[0].mxu1 %vm265_vm1, %v1233_v20  ;;  %v245_v27 = vpop.permute.xlu1 %244  ;;  %v243_v28 = vpop.permute.xlu0 %242  ;;  %1254 = vmatpush1.msk.msra.mxu0 %vm269_vm0, %v704_v21 }
  0x8c   : > { %v247_v29 = vsel %vm246_vm8, %v243_v28, %v245_v27  ;;  %v248_v30 = vsel %vm246_vm8, %v245_v27, %v243_v28  ;;  %1255 = vmatmul.mubr.msk.f32.vlgmr.msra.gmra.mrb[0].mxu0 %vm265_vm1, %v1252_v24  ;;  %420 = vmatprep.mubr.f32.mxu1 %v1324_v0  ;;  %vm986_vm8 = vmand %vm234_vm11, %vm1399_vm5 }
  0x8d   : > { %v251_v31 = vsel %vm1432_vm10, %v248_v30, 0.0  ;;  %v252_v32 = vsel %vm1424_vm9, %v247_v29, 0.0  ;;  %876 = vmatprep.mubr.f32.mxu0 %v1324_v0 }
  0x8e   : > { %1237 = vmatprep.subr.msk.mxu1 %vm269_vm0, %v252_v32 }
  0x8f   : > { %v793_v33 = vpop.permute.xlu1 %792  ;;  %1238 = vmatpush1.msk.msra.mxu1 %vm269_vm0, %v251_v31  ;;  %v791_v34 = vpop.permute.xlu0 %790 }
  0x90   : > { %v795_v35 = vsel %vm794_vm12, %v791_v34, %v793_v33  ;;  %v796_v36 = vsel %vm794_vm12, %v793_v33, %v791_v34 }
  0x91   : > { %v799_v38 = vsel %vm1404_vm7, %v795_v35, 0.0  ;;  %v800_v39 = vsel %vm798_vm13, %v796_v36, 0.0 }
  0x92   : > { %1257 = vmatprep.subr.msk.mxu0 %vm269_vm0, %v800_v39 }
  0x93   : > { %v430_v42 = vpop.permute.xlu1 %429  ;;  %1239 = vmatmul.mubr.msk.f32.vlgmr.msra.gmra.mrb[0].mxu1 %vm265_vm1, %v253_v37  ;;  %v428_v43 = vpop.permute.xlu0 %427  ;;  %1258 = vmatpush1.msk.msra.mxu0 %vm269_vm0, %v799_v38 }
  0x94   : > { %v432_v44 = vsel %vm431_vm14, %v428_v43, %v430_v42  ;;  %v433_v45 = vsel %vm431_vm14, %v430_v42, %v428_v43  ;;  %1259 = vmatmul.mubr.msk.f32.vlgmr.msra.gmra.mrb[0].mxu0 %vm265_vm1, %v1256_v40  ;;  %513 = vmatprep.mubr.f32.mxu1 %v1324_v0 }
  0x95   : > { %v436_v46 = vsel %vm1467_vm15, %v433_v45, 0.0  ;;  %v437_v47 = vsel %vm1399_vm5, %v432_v44, 0.0  ;;  %969 = vmatprep.mubr.f32.mxu0 %v1324_v0 }
  0x96   : > { %1241 = vmatprep.subr.msk.mxu1 %vm269_vm0, %v437_v47 }
  0x97   : > { %v888_v48 = vpop.permute.xlu1 %887  ;;  %1242 = vmatpush1.msk.msra.mxu1 %vm269_vm0, %v436_v46  ;;  %v886_v49 = vpop.permute.xlu0 %885 }
  0x98   : > { %v891_v50 = vsel %vm889_vm2, %v888_v48, %v886_v49  ;;  %v890_v54 = vsel %vm889_vm2, %v886_v49, %v888_v48 }
  0x99   : > { %v893_v52 = vsel %vm234_vm11, %v891_v50, 0.0 }
  0x9a   : > { %1261 = vmatprep.subr.msk.mxu0 %vm269_vm0, %v893_v52 }
  0x9b   : > { %v525_v55 = vpop.permute.xlu1 %524  ;;  %1243 = vmatmul.mubr.msk.f32.vlgmr.msra.gmra.mrb[0].mxu1 %vm265_vm1, %v1240_v51  ;;  %v523_v56 = vpop.permute.xlu0 %522  ;;  %1262 = vmatpush1.msk.msra.mxu0 %vm269_vm0, %v890_v54 }
  0x9c   : > { %v527_v57 = vsel %vm526_vm3, %v523_v56, %v525_v55  ;;  %v528_v58 = vsel %vm526_vm3, %v525_v55, %v523_v56  ;;  %1263 = vmatmul.mubr.msk.f32.vlgmr.msra.gmra.mrb[0].mxu0 %vm265_vm1, %v1260_v53  ;;  %606 = vmatprep.mubr.f32.mxu1 %v1324_v0 }
  0x9d   : > { %v529_v59 = vsel %vm1404_vm7, %v528_v58, 0.0  ;;  %v530_v60 = vsel %vm1424_vm9, %v527_v57, 0.0  ;;  %1064 = vmatprep.mubr.f32.mxu0 %v1324_v0 }
  0x9e   : > { %1245 = vmatprep.subr.msk.mxu1 %vm269_vm0, %v530_v60 }
  0x9f   : > { %v981_v61 = vpop.permute.xlu1 %980  ;;  %1246 = vmatpush1.msk.msra.mxu1 %vm269_vm0, %v529_v59  ;;  %v979_v62 = vpop.permute.xlu0 %978 }
  0xa0   : > { %v983_v63 = vsel %vm982_vm6, %v979_v62, %v981_v61  ;;  %v984_v1 = vsel %vm982_vm6, %v981_v61, %v979_v62 }
  0xa1   : > { %v987_v0 = vsel %vm1395_vm4, %v983_v63, 0.0  ;;  %v988_v3 = vsel %vm986_vm8, %v984_v1, 0.0  ;;  %vm1083_vm4 = vcmask 64512  }
  0xa2   : > { %1265 = vmatprep.subr.msk.mxu0 %vm269_vm0, %v988_v3 }
  0xa3   : > { %1247 = vmatmul.mubr.msk.f32.vlgmr.msra.gmra.mrb[0].mxu1 %vm265_vm1, %v1244_v2  ;;  %1266 = vmatpush1.msk.msra.mxu0 %vm269_vm0, %v987_v0  ;;  %vm1167_vm0 = vcmask 1024  }
  0xa4   : > { %1267 = vmatmul.mubr.msk.f32.vlgmr.msra.gmra.mrb[0].mxu0 %vm265_vm1, %v1264_v4  ;;  %1279 = vmatprep.mubr.msk.f32.mxu1 %vm1083_vm4, %v1079_v12  ;;  %vm1165_vm1 = vcmask 7168  }
 0x176   : > { %v608_v5 = vpop.f32.mrb[0].mxu1 }
 0x177   : > { %v610_v6 = vpop.f32.mrb[1].mxu1  ;;  %v1066_v7 = vpop.f32.mrb[0].mxu0 }
 0x178   : > { %v1282_v8 = vadd.f32 %v1066_v7, %v608_v5  ;;  %v1068_v9 = vpop.f32.mrb[1].mxu0 }
 0x179   : > { %v1283_v10 = vadd.f32 %v1068_v9, %v610_v6 }
 0x17b   : > { %v1073_v11 = vadd.f32 %v1283_v10, %v1282_v8 }
 0x17d   : > { %1074 = vadd.xlane.f32.xlu0 %v1073_v11 }
 0x20a   : > { %v1075_v14 = vpop.xlane.xlu0 %1074 }
 0x20b   : > { %v1076_v15 = vmul.f32 0.00390625, %v1075_v14 }
 0x20d   : > { %v1078_v16 = vadd.f32 %v1077_v13, %v1076_v15 }
 0x20f   : > { %1277 = vmatprep.subr.mxu1 %v1078_v16 }
 0x210   : > { %1278 = vmatpush3.msra.mxu1 %v1078_v16 }
 0x211   : > { %1280 = vmatmul.mubr.msk.f32.vlgmr.msra.gmra.mrb[2].mxu1 %vm1083_vm4, %v1080_v17 }
 0x2e4   : > { %v1281_v20 = vpop.f32.mrb[2].mxu1 }
 0x2e5   : > { %v1162_v21 = vadd.f32 %v1281_v20, %v1082_v18  ;;  %v1156_v22 = vpop.f32.mrb[3].mxu1 }
 0x2e6   : > { %v1157_v23 = vadd.f32 %v1156_v22, %v1081_v19 }
 0x2e7   : > { %1168 = vst.msk [vmem:[%s224_s15 + $0x8] sm:$0x3] %vm1167_vm0, %v1162_v21 }
 0x2e8   : > { %1166 = vst.msk [vmem:[%s224_s15] sm:$0xff] %vm1165_vm1, %v1157_v23 }
 0x2e9 PF: > { %s15_s18 = sadd.s32 1, %s1322_s18  }
 0x2ea   : > { %p12_p4 = scmp.ge.s32.totalorder %s15_s18, 4  }
 0x2ec   :  { %14 = sbr.rel (!%p12_p4) target bundleno = 1 (0x1), region = 78 }

</bundles_post_ra>
